<compile_context>
chip_gen: v5e
topology: v5e:2x2
jax: 0.10.0
libtpu: 0.0.40
codegen_flags: <defaults>
</compile_context>

<pallas_src>
import functools

import jax
import jax.numpy as jnp
from jax.experimental import pallas as pl
from jax.experimental.pallas import tpu as pltpu


def _round_up(n, m):
    return ((n + m - 1) // m) * m


def _ffn_kernel(x_ref, w1_ref, b1_ref, w2_ref, b2_ref, o_ref, acc_ref):
    # x_ref:  (tm, d_model_p)
    # w1_ref: (d_model_p, t_ff)     b1_ref: (1, t_ff)
    # w2_ref: (t_ff, d_model_p)     b2_ref: (1, d_model_p)
    # o_ref:  (tm, d_model_p)       acc_ref: (tm, d_model_p) f32 scratch
    k = pl.program_id(1)

    @pl.when(k == 0)
    def _():
        acc_ref[...] = jnp.zeros_like(acc_ref)

    # First matmul on this d_ff chunk; bias-1 add and ReLU are chunk-local.
    h = jnp.dot(x_ref[...], w1_ref[...], preferred_element_type=jnp.float32)
    h = jnp.maximum(h + b1_ref[...], 0.0)
    # dropout -> identity (eval mode).

    # Second matmul: accumulate this chunk's contribution in f32.
    acc_ref[...] += jnp.dot(h.astype(w2_ref.dtype), w2_ref[...],
                            preferred_element_type=jnp.float32)

    @pl.when(k == pl.num_programs(1) - 1)
    def _():
        o_ref[...] = (acc_ref[...] + b2_ref[...]).astype(o_ref.dtype)


@functools.partial(jax.jit, static_argnames=("tm", "t_ff"))
def positionwise_feed_forward(x, w1_t, b1, w2_t, b2, *, tm=256, t_ff=512):
    """x: (batch, seq, d_model) -> (batch, seq, d_model).

    Weights are passed already transposed: w1_t (d_model, d_ff), w2_t (d_ff, d_model).
    Weights/biases may be bf16 (recommended on v5e/v6e); accumulation is f32.
    """
    batch, seq, d_model = x.shape
    d_ff = w1_t.shape[1]
    M = batch * seq

    # Lane-dense padding (exact: zero rows/cols contribute zero, extras sliced off).
    d_model_p = _round_up(d_model, 128)
    d_ff_p = _round_up(d_ff, 128)

    # Clamp / align tiles: tm multiple of 16 (covers bf16 sublane packing),
    # t_ff multiple of 128 (lane axis).
    tm = _round_up(max(16, min(tm, _round_up(M, 16))), 16)
    t_ff = _round_up(max(128, min(t_ff, d_ff_p)), 128)
    M_p = _round_up(M, tm)
    d_ff_p = _round_up(d_ff_p, t_ff)

    x2d = jnp.pad(x.reshape(M, d_model),
                  ((0, M_p - M), (0, d_model_p - d_model)))
    w1p = jnp.pad(w1_t, ((0, d_model_p - d_model), (0, d_ff_p - d_ff)))
    b1p = jnp.pad(b1, (0, d_ff_p - d_ff)).reshape(1, d_ff_p)
    w2p = jnp.pad(w2_t, ((0, d_ff_p - d_ff), (0, d_model_p - d_model)))
    b2p = jnp.pad(b2, (0, d_model_p - d_model)).reshape(1, d_model_p)

    grid = (M_p // tm, d_ff_p // t_ff)

    # VMEM budget (double-buffered pipeline buffers + scratch), with headroom.
    bx = x.dtype.itemsize
    bw = w1_t.dtype.itemsize
    vmem_bytes = (
        2 * tm * d_model_p * bx            # x tiles
        + 2 * tm * d_model_p * bx          # out tiles
        + 2 * d_model_p * t_ff * bw        # W1 chunks
        + 2 * t_ff * d_model_p * bw        # W2 chunks
        + 2 * (t_ff + d_model_p) * bw      # biases
        + tm * d_model_p * 4               # f32 accumulator scratch
        + tm * t_ff * 4                    # h intermediate
    )
    # Cap at 64 MiB so the same setting is valid on v7x's smaller VMEM.
    vmem_limit = int(min(64 * 1024 * 1024,
                         max(8 * 1024 * 1024, int(vmem_bytes * 1.5) + (2 << 20))))

    flops = 2 * 2 * M_p * d_model_p * d_ff_p
    bytes_accessed = (x2d.size * bx + M_p * d_model_p * bx
                      + (w1p.size + w2p.size + b1p.size + b2p.size) * bw)

    out2d = pl.pallas_call(
        _ffn_kernel,
        out_shape=jax.ShapeDtypeStruct((M_p, d_model_p), x.dtype),
        grid_spec=pltpu.PrefetchScalarGridSpec(
            num_scalar_prefetch=0,
            grid=grid,
            in_specs=[
                pl.BlockSpec((tm, d_model_p), lambda i, k: (i, 0)),     # x tile
                pl.BlockSpec((d_model_p, t_ff), lambda i, k: (0, k)),   # W1^T chunk
                pl.BlockSpec((1, t_ff), lambda i, k: (0, k)),           # b1 chunk
                pl.BlockSpec((t_ff, d_model_p), lambda i, k: (k, 0)),   # W2^T chunk
                pl.BlockSpec((1, d_model_p), lambda i, k: (0, 0)),      # b2
            ],
            out_specs=pl.BlockSpec((tm, d_model_p), lambda i, k: (i, 0)),
            scratch_shapes=[pltpu.VMEM((tm, d_model_p), jnp.float32)],
        ),
        compiler_params=pltpu.CompilerParams(
            dimension_semantics=("parallel", "arbitrary"),
            vmem_limit_bytes=vmem_limit,
        ),
        cost_estimate=pl.CostEstimate(flops=flops, transcendentals=0,
                                      bytes_accessed=bytes_accessed),
    )(x2d, w1p, b1p, w2p, b2p)

    return out2d[:M, :d_model].reshape(batch, seq, d_model)


def _init_params(key, d_model, d_ff, dtype=jnp.float32):
    # Deterministic synthetic init (mimics nn.Linear's uniform(-1/sqrt(in), 1/sqrt(in))).
    k1, k2, k3, k4 = jax.random.split(key, 4)
    lim1 = 1.0 / jnp.sqrt(d_model)
    lim2 = 1.0 / jnp.sqrt(d_ff)
    # Stored already transposed: (in_features, out_features).
    w1_t = jax.random.uniform(k1, (d_model, d_ff), dtype, -lim1, lim1)
    b1 = jax.random.uniform(k2, (d_ff,), dtype, -lim1, lim1)
    w2_t = jax.random.uniform(k3, (d_ff, d_model), dtype, -lim2, lim2)
    b2 = jax.random.uniform(k4, (d_ff,), dtype, -lim2, lim2)[:d_model]
    return w1_t, b1, w2_t, b2


if __name__ == "__main__":
    batch, seq, d_model, d_ff = 2, 8, 32, 64

    key = jax.random.PRNGKey(0)
    kx, kp = jax.random.split(key)
    x = jax.random.normal(kx, (batch, seq, d_model), jnp.float32)
    w1_t, b1, w2_t, b2 = _init_params(kp, d_model, d_ff)

    out = positionwise_feed_forward(x, w1_t, b1, w2_t, b2)
    out = jax.block_until_ready(out)

    # Pure-JAX reference check (dropout = identity in eval mode).
    ref = jnp.maximum(x @ w1_t + b1, 0.0) @ w2_t + b2
    assert out.shape == (batch, seq, d_model)
    assert jnp.allclose(out, ref, atol=1e-4, rtol=1e-4)

    print("KERNEL_OK")
</pallas_src>

<mosaic_0001>
module attributes {stable_mosaic.version = 11 : i64} {
  func.func @_ffn_kernel(%arg0: i32, %arg1: i32, %arg2: memref<16x128xf32, #tpu.memory_space<vmem>>, %arg3: memref<128x128xf32, #tpu.memory_space<vmem>>, %arg4: memref<1x128xf32, #tpu.memory_space<vmem>>, %arg5: memref<128x128xf32, #tpu.memory_space<vmem>>, %arg6: memref<1x128xf32, #tpu.memory_space<vmem>>, %arg7: memref<16x128xf32, #tpu.memory_space<vmem>>, %arg8: memref<16x128xf32, #tpu.memory_space<vmem>>) attributes {dimension_semantics = [#tpu.dimension_semantics<parallel>, #tpu.dimension_semantics<arbitrary>], iteration_bounds = array<i64: 1, 1>, scalar_prefetch = 0 : i64, scratch_operands = 1 : i64, tpu.core_type = #tpu.core_type<tc>, window_params = [{transform_indices = @transform_0, window_bounds = array<i64: 16, 128>}, {transform_indices = @transform_1, window_bounds = array<i64: 128, 128>}, {transform_indices = @transform_2, window_bounds = array<i64: 1, 128>}, {transform_indices = @transform_3, window_bounds = array<i64: 128, 128>}, {pipeline_mode = #tpu.pipeline_mode<synchronous>, transform_indices = @transform_4, window_bounds = array<i64: 1, 128>}, {transform_indices = @transform_5, window_bounds = array<i64: 16, 128>}]} {
    %c0_i32 = arith.constant 0 : i32
    %0 = arith.cmpi eq, %arg1, %c0_i32 : i32
    %1 = arith.extui %0 : i1 to i32
    %c0_i32_0 = arith.constant 0 : i32
    %2 = arith.cmpi ne, %1, %c0_i32_0 : i32
    scf.if %2 {
      %cst_16 = arith.constant 0.000000e+00 : f32
      %19 = vector.broadcast %cst_16 : f32 to vector<16x128xf32>
      %c0_17 = arith.constant 0 : index
      %c0_18 = arith.constant 0 : index
      %20 = vector.load %arg8[%c0_17, %c0_18] : memref<16x128xf32, #tpu.memory_space<vmem>>, vector<16x128xf32>
      tpu.vector_store %arg8[%c0_17, %c0_18], %19 {strides = array<i32>} : memref<16x128xf32, #tpu.memory_space<vmem>>, vector<16x128xf32>,
    } else {
    }
    %c0 = arith.constant 0 : index
    %c0_1 = arith.constant 0 : index
    %3 = vector.load %arg2[%c0, %c0_1] : memref<16x128xf32, #tpu.memory_space<vmem>>, vector<16x128xf32>
    %c0_2 = arith.constant 0 : index
    %c0_3 = arith.constant 0 : index
    %4 = vector.load %arg3[%c0_2, %c0_3] : memref<128x128xf32, #tpu.memory_space<vmem>>, vector<128x128xf32>
    %cst = arith.constant dense<0.000000e+00> : vector<16x128xf32>
    %5 = tpu.matmul %3, %4, %cst {dimension_numbers = #tpu.dot_dimension_numbers<[1], [0], [0], [1], [0, 0, 1, 1], [], []>} : vector<16x128xf32>, vector<128x128xf32>, vector<16x128xf32> -> vector<16x128xf32>
    %c0_4 = arith.constant 0 : index
    %c0_5 = arith.constant 0 : index
    %6 = vector.load %arg4[%c0_4, %c0_5] : memref<1x128xf32, #tpu.memory_space<vmem>>, vector<1x128xf32>
    %7 = vector.broadcast %6 : vector<1x128xf32> to vector<16x128xf32>
    %8 = arith.addf %5, %7 : vector<16x128xf32>
    %cst_6 = arith.constant 0.000000e+00 : f32
    %9 = vector.broadcast %cst_6 : f32 to vector<16x128xf32>
    %10 = arith.maximumf %8, %9 : vector<16x128xf32>
    %c0_7 = arith.constant 0 : index
    %c0_8 = arith.constant 0 : index
    %11 = vector.load %arg8[%c0_7, %c0_8] : memref<16x128xf32, #tpu.memory_space<vmem>>, vector<16x128xf32>
    %c0_9 = arith.constant 0 : index
    %c0_10 = arith.constant 0 : index
    %12 = vector.load %arg5[%c0_9, %c0_10] : memref<128x128xf32, #tpu.memory_space<vmem>>, vector<128x128xf32>
    %cst_11 = arith.constant dense<0.000000e+00> : vector<16x128xf32>
    %13 = tpu.matmul %10, %12, %cst_11 {dimension_numbers = #tpu.dot_dimension_numbers<[1], [0], [0], [1], [0, 0, 1, 1], [], []>} : vector<16x128xf32>, vector<128x128xf32>, vector<16x128xf32> -> vector<16x128xf32>
    %14 = arith.addf %11, %13 : vector<16x128xf32>
    %c0_12 = arith.constant 0 : index
    %c0_13 = arith.constant 0 : index
    %15 = vector.load %arg8[%c0_12, %c0_13] : memref<16x128xf32, #tpu.memory_space<vmem>>, vector<16x128xf32>
    tpu.vector_store %arg8[%c0_12, %c0_13], %14 {strides = array<i32>} : memref<16x128xf32, #tpu.memory_space<vmem>>, vector<16x128xf32>,
    %c0_i32_14 = arith.constant 0 : i32
    %16 = arith.cmpi eq, %arg1, %c0_i32_14 : i32
    %17 = arith.extui %16 : i1 to i32
    %c0_i32_15 = arith.constant 0 : i32
    %18 = arith.cmpi ne, %17, %c0_i32_15 : i32
    scf.if %18 {
      %c0_16 = arith.constant 0 : index
      %c0_17 = arith.constant 0 : index
      %19 = vector.load %arg8[%c0_16, %c0_17] : memref<16x128xf32, #tpu.memory_space<vmem>>, vector<16x128xf32>
      %c0_18 = arith.constant 0 : index
      %c0_19 = arith.constant 0 : index
      %20 = vector.load %arg6[%c0_18, %c0_19] : memref<1x128xf32, #tpu.memory_space<vmem>>, vector<1x128xf32>
      %21 = vector.broadcast %20 : vector<1x128xf32> to vector<16x128xf32>
      %22 = arith.addf %19, %21 : vector<16x128xf32>
      %c0_20 = arith.constant 0 : index
      %c0_21 = arith.constant 0 : index
      %23 = vector.load %arg7[%c0_20, %c0_21] : memref<16x128xf32, #tpu.memory_space<vmem>>, vector<16x128xf32>
      tpu.vector_store %arg7[%c0_20, %c0_21], %22 {strides = array<i32>} : memref<16x128xf32, #tpu.memory_space<vmem>>, vector<16x128xf32>,
    } else {
    }
    return
  }
  func.func @transform_0(%arg0: i32, %arg1: i32) -> (i32, i32) {
    %c0_i32 = arith.constant 0 : i32
    %c0_i32_0 = arith.constant 0 : i32
    return %arg0, %c0_i32 : i32, i32
  }
  func.func @transform_1(%arg0: i32, %arg1: i32) -> (i32, i32) {
    %c0_i32 = arith.constant 0 : i32
    %c0_i32_0 = arith.constant 0 : i32
    return %c0_i32, %arg1 : i32, i32
  }
  func.func @transform_2(%arg0: i32, %arg1: i32) -> (i32, i32) {
    %c0_i32 = arith.constant 0 : i32
    %c0_i32_0 = arith.constant 0 : i32
    return %c0_i32, %arg1 : i32, i32
  }
  func.func @transform_3(%arg0: i32, %arg1: i32) -> (i32, i32) {
    %c0_i32 = arith.constant 0 : i32
    %c0_i32_0 = arith.constant 0 : i32
    return %arg1, %c0_i32 : i32, i32
  }
  func.func @transform_4(%arg0: i32, %arg1: i32) -> (i32, i32) {
    %c0_i32 = arith.constant 0 : i32
    %c0_i32_0 = arith.constant 0 : i32
    %c0_i32_1 = arith.constant 0 : i32
    return %c0_i32, %c0_i32_0 : i32, i32
  }
  func.func @transform_5(%arg0: i32, %arg1: i32) -> (i32, i32) {
    %c0_i32 = arith.constant 0 : i32
    %c0_i32_0 = arith.constant 0 : i32
    return %arg0, %c0_i32 : i32, i32
  }
}

</mosaic_0001>

<bundles_post_ra>
// kernel: positionwise_feed_forward.1
= control target key start
LH: loop header
LB: loop body
LE: loop exit
PB: predicated region body
PF: predicated region fallthrough
CT: control target
= control target key end

     0   :  { %s313_s1 = inlined_call_operand.vmem [shape: f32[128,128], index: 1, kind: input, shape index: {}]   ;;  %s314_s3 = inlined_call_operand.vmem [shape: f32[128,128], index: 3, kind: input, shape index: {}]   ;;  %s315_s2 = inlined_call_operand.vmem [shape: f32[1,128], index: 2, kind: input, shape index: {}]   ;;  %s316_s0 = inlined_call_operand.vmem [shape: f32[16,128], index: 0, kind: input, shape index: {}]   ;;  %s317_s4 = inlined_call_operand.vmem [shape: f32[1,128], index: 4, kind: input, shape index: {}]   ;;  %s318_s5 = inlined_call_operand.vmem [shape: f32[16,128], index: 5, kind: output, shape index: {}]  }
   0x1   :  { %v43_v0 = vld [vmem:[%s313_s1 + $0x78] sm:$0xff]  ;;  %v42_v1 = vld [vmem:[%s313_s1 + $0x70] sm:$0xff]  ;;  %v41_v2 = vld [vmem:[%s313_s1 + $0x68] sm:$0xff] }
   0x2   :  { %135 = vmatpush.msra.mxu2 %v43_v0  ;;  %48 = vmatpush.msra.mxu0 %v43_v0  ;;  %v40_v3 = vld [vmem:[%s313_s1 + $0x60] sm:$0xff]  ;;  %v39_v4 = vld [vmem:[%s313_s1 + $0x58] sm:$0xff]  ;;  %v89_v6 = vld [vmem:[%s314_s3 + $0x70] sm:$0xff] }
   0x3   :  { %v90_v5 = vld [vmem:[%s314_s3 + $0x78] sm:$0xff]  ;;  %v38_v7 = vld [vmem:[%s313_s1 + $0x50] sm:$0xff]  ;;  %v88_v8 = vld [vmem:[%s314_s3 + $0x68] sm:$0xff] }
   0x4   :  { %136 = vmatpush.msra.mxu2 %v42_v1  ;;  %49 = vmatpush.msra.mxu0 %v42_v1  ;;  %v37_v9 = vld [vmem:[%s313_s1 + $0x48] sm:$0xff]  ;;  %v87_v10 = vld [vmem:[%s314_s3 + $0x60] sm:$0xff]  ;;  %v86_v12 = vld [vmem:[%s314_s3 + $0x58] sm:$0xff] }
   0x5   :  { %151 = vmatpush.msra.mxu3 %v90_v5  ;;  %91 = vmatpush.msra.mxu1 %v90_v5  ;;  %v36_v11 = vld [vmem:[%s313_s1 + $0x40] sm:$0xff]  ;;  %v35_v13 = vld [vmem:[%s313_s1 + $0x38] sm:$0xff]  ;;  %v85_v14 = vld [vmem:[%s314_s3 + $0x50] sm:$0xff] }
   0x6   :  { %137 = vmatpush.msra.mxu2 %v41_v2  ;;  %50 = vmatpush.msra.mxu0 %v41_v2  ;;  %v34_v15 = vld [vmem:[%s313_s1 + $0x30] sm:$0xff]  ;;  %v84_v16 = vld [vmem:[%s314_s3 + $0x48] sm:$0xff]  ;;  %v83_v18 = vld [vmem:[%s314_s3 + $0x40] sm:$0xff] }
   0x7   :  { %152 = vmatpush.msra.mxu3 %v89_v6  ;;  %92 = vmatpush.msra.mxu1 %v89_v6  ;;  %v33_v17 = vld [vmem:[%s313_s1 + $0x28] sm:$0xff]  ;;  %v32_v19 = vld [vmem:[%s313_s1 + $0x20] sm:$0xff]  ;;  %v82_v20 = vld [vmem:[%s314_s3 + $0x38] sm:$0xff] }
   0x8   :  { %138 = vmatpush.msra.mxu2 %v40_v3  ;;  %51 = vmatpush.msra.mxu0 %v40_v3  ;;  %v31_v21 = vld [vmem:[%s313_s1 + $0x18] sm:$0xff]  ;;  %v81_v22 = vld [vmem:[%s314_s3 + $0x30] sm:$0xff]  ;;  %v80_v24 = vld [vmem:[%s314_s3 + $0x28] sm:$0xff] }
   0x9   :  { %153 = vmatpush.msra.mxu3 %v88_v8  ;;  %93 = vmatpush.msra.mxu1 %v88_v8  ;;  %v30_v23 = vld [vmem:[%s313_s1 + $0x10] sm:$0xff]  ;;  %v29_v25 = vld [vmem:[%s313_s1 + $0x8] sm:$0xff]  ;;  %v79_v26 = vld [vmem:[%s314_s3 + $0x20] sm:$0xff] }
   0xa   :  { %139 = vmatpush.msra.mxu2 %v39_v4  ;;  %52 = vmatpush.msra.mxu0 %v39_v4  ;;  %v28_v27 = vld [vmem:[%s313_s1] sm:$0xff]  ;;  %v27_v28 = vld [vmem:[%s316_s0 + $0x8] sm:$0xff]  ;;  %v78_v30 = vld [vmem:[%s314_s3 + $0x18] sm:$0xff] }
   0xb   :  { %154 = vmatpush.msra.mxu3 %v87_v10  ;;  %94 = vmatpush.msra.mxu1 %v87_v10  ;;  %v26_v29 = vld [vmem:[%s316_s0] sm:$0xff]  ;;  %v77_v31 = vld [vmem:[%s314_s3 + $0x10] sm:$0xff]  ;;  %v76_v32 = vld [vmem:[%s314_s3 + $0x8] sm:$0xff] }
   0xc   :  { %140 = vmatpush.msra.mxu2 %v38_v7  ;;  %53 = vmatpush.msra.mxu0 %v38_v7  ;;  %v75_v33 = vld [vmem:[%s314_s3] sm:$0xff] }
   0xd   :  { %155 = vmatpush.msra.mxu3 %v86_v12  ;;  %95 = vmatpush.msra.mxu1 %v86_v12  ;;  %v167_v34 = vld [vmem:[%s315_s2] ss:$0 sm:$0xff] }
   0xe   :  { %141 = vmatpush.msra.mxu2 %v37_v9  ;;  %54 = vmatpush.msra.mxu0 %v37_v9  ;;  %v168_v41 = vld [vmem:[%s317_s4] ss:$0 sm:$0xff] }
   0xf   :  { %156 = vmatpush.msra.mxu3 %v85_v14  ;;  %96 = vmatpush.msra.mxu1 %v85_v14 }
  0x10   :  { %142 = vmatpush.msra.mxu2 %v36_v11  ;;  %55 = vmatpush.msra.mxu0 %v36_v11 }
  0x11   :  { %157 = vmatpush.msra.mxu3 %v84_v16  ;;  %97 = vmatpush.msra.mxu1 %v84_v16 }
  0x12   :  { %143 = vmatpush.msra.mxu2 %v35_v13  ;;  %56 = vmatpush.msra.mxu0 %v35_v13 }
  0x13   :  { %158 = vmatpush.msra.mxu3 %v83_v18  ;;  %98 = vmatpush.msra.mxu1 %v83_v18 }
  0x14   :  { %144 = vmatpush.msra.mxu2 %v34_v15  ;;  %57 = vmatpush.msra.mxu0 %v34_v15 }
  0x15   :  { %159 = vmatpush.msra.mxu3 %v82_v20  ;;  %99 = vmatpush.msra.mxu1 %v82_v20 }
  0x16   :  { %145 = vmatpush.msra.mxu2 %v33_v17  ;;  %58 = vmatpush.msra.mxu0 %v33_v17 }
  0x17   :  { %160 = vmatpush.msra.mxu3 %v81_v22  ;;  %100 = vmatpush.msra.mxu1 %v81_v22 }
  0x18   :  { %146 = vmatpush.msra.mxu2 %v32_v19  ;;  %59 = vmatpush.msra.mxu0 %v32_v19 }
  0x19   :  { %161 = vmatpush.msra.mxu3 %v80_v24  ;;  %101 = vmatpush.msra.mxu1 %v80_v24 }
  0x1a   :  { %147 = vmatpush.msra.mxu2 %v31_v21  ;;  %60 = vmatpush.msra.mxu0 %v31_v21 }
  0x1b   :  { %162 = vmatpush.msra.mxu3 %v79_v26  ;;  %102 = vmatpush.msra.mxu1 %v79_v26 }
  0x1c   :  { %148 = vmatpush.msra.mxu2 %v30_v23  ;;  %61 = vmatpush.msra.mxu0 %v30_v23 }
  0x1d   :  { %163 = vmatpush.msra.mxu3 %v78_v30  ;;  %103 = vmatpush.msra.mxu1 %v78_v30 }
  0x1e   :  { %149 = vmatpush.msra.mxu2 %v29_v25  ;;  %62 = vmatpush.msra.mxu0 %v29_v25 }
  0x1f   :  { %164 = vmatpush.msra.mxu3 %v77_v31  ;;  %104 = vmatpush.msra.mxu1 %v77_v31 }
  0x20   :  { %150 = vmatpush.msra.mxu2 %v28_v27  ;;  %63 = vmatpush.msra.mxu0 %v28_v27 }
  0x21   :  { %67 = vmatmul.f32.vlgmr.msra.gmra.mxu2 %v27_v28  ;;  %64 = vmatmul.f32.vlgmr.msra.gmra.mxu0 %v26_v29 }
  0x22   :  { %165 = vmatpush.msra.mxu3 %v76_v32  ;;  %105 = vmatpush.msra.mxu1 %v76_v32 }
  0x24   :  { %166 = vmatpush.msra.mxu3 %v75_v33  ;;  %106 = vmatpush.msra.mxu1 %v75_v33 }
  0x9e   :  { %v65_v35 = vpop.f32.mrf.mxu0 }
  0x9f   :  { %v66_v36 = vadd.f32 %v167_v34, %v65_v35 }
  0xa1   :  { %v71_v37 = vmax.f32 %v66_v36, 0.0 }
  0xa3   :  { %107 = vmatmul.f32.vlgmr.msra.gmra.mxu1 %v71_v37 }
  0xa4   :  { %v68_v38 = vpop.f32.mrf.mxu2 }
  0xa5   :  { %v69_v39 = vadd.f32 %v167_v34, %v68_v38 }
  0xa7   :  { %v72_v40 = vmax.f32 %v69_v39, 0.0 }
  0xa9   :  { %110 = vmatmul.f32.vlgmr.msra.gmra.mxu3 %v72_v40 }
 0x120   :  { %v108_v42 = vpop.f32.mrf.mxu1 }
 0x121   :  { %v127_v43 = vadd.f32 %v168_v41, %v108_v42 }
 0x123   :  { %129 = vst [vmem:[%s318_s5] sm:$0xff] %v127_v43 }
 0x12c   :  { %v111_v44 = vpop.f32.mrf.mxu3 }
 0x12d   :  { %v128_v45 = vadd.f32 %v168_v41, %v111_v44 }
 0x12f   :  { %130 = vst [vmem:[%s318_s5 + $0x8] sm:$0xff] %v128_v45 }

</bundles_post_ra>
